<compile_context>
chip_gen: v7x
topology: tpu7x:2x2x1
jax: 0.10.0
libtpu: 0.0.40
codegen_flags: <defaults>
</compile_context>

<pallas_src>
import functools

import jax
import jax.numpy as jnp
from jax.experimental import pallas as pl
from jax.experimental.pallas import tpu as pltpu


# ----------------------------------------------------------------------------
# Encoder kernel: recurrent part of the LSTM only (input projections are
# precomputed).  Single grid point; in-kernel time loop; h/c in VMEM scratch.
# ----------------------------------------------------------------------------
def _encoder_kernel(xg_ref, lens_ref, whh_ref, hlast_ref, h_sc, c_sc, *, hidden):
    # xg_ref : (S, Bp, 4H)  precomputed  x_t @ W_ih + b
    # lens_ref: (Bp, 1) int32 sequence lengths
    # whh_ref: (H, 4H)
    S = xg_ref.shape[0]
    H = hidden

    h_sc[...] = jnp.zeros_like(h_sc)
    c_sc[...] = jnp.zeros_like(c_sc)

    @pl.loop(0, S)
    def _(t):
        h = h_sc[...]
        c = c_sc[...]
        gates = xg_ref[t] + jnp.dot(h, whh_ref[...],
                                    preferred_element_type=jnp.float32)
        i = jax.nn.sigmoid(gates[:, 0 * H:1 * H])
        f = jax.nn.sigmoid(gates[:, 1 * H:2 * H])
        g = jnp.tanh(gates[:, 2 * H:3 * H])
        o = jax.nn.sigmoid(gates[:, 3 * H:4 * H])
        c_new = f * c + i * g
        h_new = o * jnp.tanh(c_new)

        # only advance state while t < length[b]: carried state at the end is
        # the hidden state at the last valid step.
        valid = lens_ref[...] > t                      # (Bp, 1)
        h_sc[...] = jnp.where(valid, h_new, h)
        c_sc[...] = jnp.where(valid, c_new, c)

    hlast_ref[...] = h_sc[...]


# ----------------------------------------------------------------------------
# Autoregressive decoder kernel: z -> h0, then one LSTM step per loop iter.
# Sensor+route heads are fused into a single lane-dense output that is also
# the next-step input.  Whole (S, Bp, OUTP) output written from in-kernel loop.
# ----------------------------------------------------------------------------
def _decoder_kernel(z_ref, wz_ref, bz_ref,
                    wih_ref, whh_ref, b_ref,
                    wout_ref, bout_ref,
                    out_ref, h_sc, c_sc, prev_sc, *, hidden):
    S = out_ref.shape[0]
    H = hidden

    h_sc[...] = jnp.tanh(
        jnp.dot(z_ref[...], wz_ref[...],
                preferred_element_type=jnp.float32) + bz_ref[...])
    c_sc[...] = jnp.zeros_like(c_sc)
    prev_sc[...] = jnp.zeros_like(prev_sc)             # zero start token

    @pl.loop(0, S)
    def _(t):
        h = h_sc[...]
        c = c_sc[...]
        x_t = prev_sc[...]                             # (Bp, OUTP)

        gates = (jnp.dot(x_t, wih_ref[...], preferred_element_type=jnp.float32)
                 + jnp.dot(h, whh_ref[...], preferred_element_type=jnp.float32)
                 + b_ref[...])
        i = jax.nn.sigmoid(gates[:, 0 * H:1 * H])
        f = jax.nn.sigmoid(gates[:, 1 * H:2 * H])
        g = jnp.tanh(gates[:, 2 * H:3 * H])
        o = jax.nn.sigmoid(gates[:, 3 * H:4 * H])
        c_new = f * c + i * g
        h_new = o * jnp.tanh(c_new)

        # fused [sensor | route | zero-pad] head: lane-dense, and it is directly
        # the next-step input (padded lanes have zero weights/bias -> stay 0).
        out_t = jnp.dot(h_new, wout_ref[...],
                        preferred_element_type=jnp.float32) + bout_ref[...]

        h_sc[...] = h_new
        c_sc[...] = c_new
        prev_sc[...] = out_t
        out_ref[t] = out_t


# ----------------------------------------------------------------------------
# Parameter construction (deterministic, synthetic weights).
# ----------------------------------------------------------------------------
def init_params(key, sensor_dim, num_routes, route_emb_dim, num_hidden,
                num_latent):
    ks = jax.random.split(key, 16)
    enc_in = route_emb_dim + sensor_dim
    dec_in = sensor_dim + num_routes
    s = 0.1

    def rnd(k, shape):
        return (s * jax.random.normal(k, shape)).astype(jnp.float32)

    return dict(
        route_emb=rnd(ks[0], (num_routes, route_emb_dim)),
        # encoder LSTM (weights stored transposed vs. PyTorch: (in, 4H))
        enc_wih=rnd(ks[1], (enc_in, 4 * num_hidden)),
        enc_whh=rnd(ks[2], (num_hidden, 4 * num_hidden)),
        enc_b=rnd(ks[3], (1, 4 * num_hidden)),
        # z heads
        w_mean=rnd(ks[4], (num_hidden, num_latent)),
        b_mean=rnd(ks[5], (1, num_latent)),
        w_lvar=rnd(ks[6], (num_hidden, num_latent)),
        b_lvar=rnd(ks[7], (1, num_latent)),
        # decoder
        dec_wz=rnd(ks[8], (num_latent, num_hidden)),
        dec_bz=rnd(ks[9], (1, num_hidden)),
        dec_wih=rnd(ks[10], (dec_in, 4 * num_hidden)),
        dec_whh=rnd(ks[11], (num_hidden, 4 * num_hidden)),
        dec_b=rnd(ks[12], (1, 4 * num_hidden)),
        dec_ws=rnd(ks[13], (num_hidden, sensor_dim)),
        dec_bs=rnd(ks[14], (1, sensor_dim)),
        dec_wr=rnd(ks[15], (num_hidden, num_routes)),
        dec_br=jnp.zeros((1, num_routes), jnp.float32),
    )


# ----------------------------------------------------------------------------
# Wrapper: glue (embedding gather, input projection, padding, transposes) in
# plain JAX; the recurrent hot path in Pallas.
# ----------------------------------------------------------------------------
def vrae_forward(params, routes, times, lengths, eps, *,
                 sensor_dim, num_routes, route_emb_dim, num_hidden,
                 num_latent, dec_seq_len=None):
    B, S = routes.shape
    H, L = num_hidden, num_latent
    dec_out = sensor_dim + num_routes

    # Static decoder length instead of lengths.max().item() (host sync).
    # TODO(synk): PyTorch takes lengths.max().item(); caller passes it statically.
    if dec_seq_len is None:
        dec_seq_len = S

    # pad batch to a sublane multiple (>=8) for vreg / MXU-row utilisation
    SUB = 8
    Bp = max(SUB, ((B + SUB - 1) // SUB) * SUB)
    pad_b = Bp - B

    # ----- encoder: embed routes, concat sensor features, precompute the
    # time-parallel input projection as one big matmul (not recurrent).
    emb = params["route_emb"][routes]                                  # (B,S,E)
    x = jnp.concatenate([emb, times.astype(jnp.float32)], axis=-1)     # (B,S,in)
    xg = jnp.einsum("bsi,ig->bsg", x, params["enc_wih"]) + params["enc_b"]
    xg = jnp.transpose(xg, (1, 0, 2))                                  # (S,B,4H)
    xg = jnp.pad(xg, ((0, 0), (0, pad_b), (0, 0)))
    lens2d = jnp.pad(lengths.reshape(B, 1).astype(jnp.int32),
                     ((0, pad_b), (0, 0)))

    def full(shape):
        return pl.BlockSpec(shape, lambda i: (0,) * len(shape))

    h_last = pl.pallas_call(
        functools.partial(_encoder_kernel, hidden=H),
        out_shape=jax.ShapeDtypeStruct((Bp, H), jnp.float32),
        grid_spec=pltpu.PrefetchScalarGridSpec(
            num_scalar_prefetch=0,
            grid=(1,),
            in_specs=[full((S, Bp, 4 * H)),      # precomputed input projections
                      full((Bp, 1)),             # lengths
                      full((H, 4 * H))],         # W_hh
            out_specs=full((Bp, H)),
            scratch_shapes=[pltpu.VMEM((Bp, H), jnp.float32),
                            pltpu.VMEM((Bp, H), jnp.float32)],
        ),
        compiler_params=pltpu.CompilerParams(
            dimension_semantics=("arbitrary",)),
    )(xg, lens2d, params["enc_whh"])

    # ----- z heads + reparameterisation (run once -> plain JAX)
    z_mean_p = h_last @ params["w_mean"] + params["b_mean"]
    z_log_var_p = h_last @ params["w_lvar"] + params["b_lvar"]
    eps_p = jnp.pad(eps, ((0, pad_b), (0, 0)))
    z_p = z_mean_p + jnp.exp(0.5 * z_log_var_p) * eps_p

    # ----- decoder: pack fused lane-dense head weights (sensor|route|zero-pad)
    OUTP = ((dec_out + 127) // 128) * 128
    wout = jnp.zeros((H, OUTP), jnp.float32)
    wout = wout.at[:, :sensor_dim].set(params["dec_ws"])
    wout = wout.at[:, sensor_dim:dec_out].set(params["dec_wr"])
    bout = jnp.zeros((1, OUTP), jnp.float32)
    bout = bout.at[:, :sensor_dim].set(params["dec_bs"])
    bout = bout.at[:, sensor_dim:dec_out].set(params["dec_br"])
    wih_p = jnp.zeros((OUTP, 4 * H), jnp.float32)
    wih_p = wih_p.at[:dec_out, :].set(params["dec_wih"])

    dec_seq = pl.pallas_call(
        functools.partial(_decoder_kernel, hidden=H),
        out_shape=jax.ShapeDtypeStruct((dec_seq_len, Bp, OUTP), jnp.float32),
        grid_spec=pltpu.PrefetchScalarGridSpec(
            num_scalar_prefetch=0,
            grid=(1,),
            in_specs=[full((Bp, L)),                       # z
                      full((L, H)), full((1, H)),          # z -> h0
                      full((OUTP, 4 * H)),                 # W_ih (padded rows)
                      full((H, 4 * H)),                    # W_hh
                      full((1, 4 * H)),                    # bias
                      full((H, OUTP)), full((1, OUTP))],   # fused output head
            out_specs=full((dec_seq_len, Bp, OUTP)),
            scratch_shapes=[pltpu.VMEM((Bp, H), jnp.float32),
                            pltpu.VMEM((Bp, H), jnp.float32),
                            pltpu.VMEM((Bp, OUTP), jnp.float32)],
        ),
        compiler_params=pltpu.CompilerParams(
            dimension_semantics=("arbitrary",)),
    )(z_p, params["dec_wz"], params["dec_bz"],
      wih_p, params["dec_whh"], params["dec_b"], wout, bout)

    recon = jnp.transpose(dec_seq, (1, 0, 2))[:B]          # (B, S_dec, OUTP)
    sensor_recon = recon[:, :, :sensor_dim]
    route_recon = recon[:, :, sensor_dim:dec_out]

    return (z_mean_p[:B], z_log_var_p[:B], z_p[:B], sensor_recon, route_recon)


if __name__ == "__main__":
    # small, deterministic example shapes
    batch, seq_len = 2, 8
    sensor_dim, num_routes, route_emb_dim = 4, 6, 8
    num_hidden, num_latent = 32, 16

    key = jax.random.PRNGKey(0)
    k_par, k_rt, k_tm, k_eps = jax.random.split(key, 4)

    params = init_params(k_par, sensor_dim, num_routes, route_emb_dim,
                         num_hidden, num_latent)

    routes = jax.random.randint(k_rt, (batch, seq_len), 0, num_routes,
                                dtype=jnp.int32)
    times = jax.random.normal(k_tm, (batch, seq_len, sensor_dim),
                              dtype=jnp.float32)
    lengths = jnp.array([seq_len, 5], dtype=jnp.int32)
    eps = jax.random.normal(k_eps, (batch, num_latent), dtype=jnp.float32)

    # TODO(synk): Encoder/AutoRegressiveDecoder internals are not in the given
    # source; a standard single-layer LSTM VRAE structure is assumed here.
    out = vrae_forward(params, routes, times, lengths, eps,
                       sensor_dim=sensor_dim, num_routes=num_routes,
                       route_emb_dim=route_emb_dim, num_hidden=num_hidden,
                       num_latent=num_latent,
                       dec_seq_len=seq_len)   # == lengths.max() statically
    out = jax.block_until_ready(out)

    z_mean, z_log_var, z, sensor_recon, route_recon = out
    assert z_mean.shape == (batch, num_latent)
    assert z_log_var.shape == (batch, num_latent)
    assert z.shape == (batch, num_latent)
    assert sensor_recon.shape == (batch, seq_len, sensor_dim)
    assert route_recon.shape == (batch, seq_len, num_routes)
    print("KERNEL_OK")
</pallas_src>

<mosaic_0001>
module attributes {stable_mosaic.version = 11 : i64} {
  func.func @_encoder_kernel(%arg0: i32, %arg1: memref<8x8x128xf32, #tpu.memory_space<vmem>>, %arg2: memref<8x1xi32, #tpu.memory_space<vmem>>, %arg3: memref<32x128xf32, #tpu.memory_space<vmem>>, %arg4: memref<8x32xf32, #tpu.memory_space<vmem>>, %arg5: memref<8x32xf32, #tpu.memory_space<vmem>>, %arg6: memref<8x32xf32, #tpu.memory_space<vmem>>) attributes {dimension_semantics = [#tpu.dimension_semantics<arbitrary>], iteration_bounds = array<i64: 1>, scalar_prefetch = 0 : i64, scratch_operands = 2 : i64, tpu.core_type = #tpu.core_type<tc>, window_params = [{pipeline_mode = #tpu.pipeline_mode<synchronous>, transform_indices = @transform_0, window_bounds = array<i64: 8, 8, 128>}, {pipeline_mode = #tpu.pipeline_mode<synchronous>, transform_indices = @transform_1, window_bounds = array<i64: 8, 1>}, {pipeline_mode = #tpu.pipeline_mode<synchronous>, transform_indices = @transform_2, window_bounds = array<i64: 32, 128>}, {pipeline_mode = #tpu.pipeline_mode<synchronous>, transform_indices = @transform_3, window_bounds = array<i64: 8, 32>}]} {
    %cst = arith.constant 0.000000e+00 : f32
    %0 = vector.broadcast %cst : f32 to vector<8x32xf32>
    %c0 = arith.constant 0 : index
    %c0_0 = arith.constant 0 : index
    %1 = vector.load %arg5[%c0, %c0_0] : memref<8x32xf32, #tpu.memory_space<vmem>>, vector<8x32xf32>
    tpu.vector_store %arg5[%c0, %c0_0], %0 {strides = array<i32>} : memref<8x32xf32, #tpu.memory_space<vmem>>, vector<8x32xf32>,
    %cst_1 = arith.constant 0.000000e+00 : f32
    %2 = vector.broadcast %cst_1 : f32 to vector<8x32xf32>
    %c0_2 = arith.constant 0 : index
    %c0_3 = arith.constant 0 : index
    %3 = vector.load %arg6[%c0_2, %c0_3] : memref<8x32xf32, #tpu.memory_space<vmem>>, vector<8x32xf32>
    tpu.vector_store %arg6[%c0_2, %c0_3], %2 {strides = array<i32>} : memref<8x32xf32, #tpu.memory_space<vmem>>, vector<8x32xf32>,
    %c0_i32 = arith.constant 0 : i32
    %c8_i32 = arith.constant 8 : i32
    %4 = arith.addi %c0_i32, %c8_i32 : i32
    %c1_i32 = arith.constant 1 : i32
    scf.for %arg7 = %c0_i32 to %4 step %c1_i32  : i32 {
      %c1_i32_9 = arith.constant 1 : i32
      %7 = arith.muli %arg7, %c1_i32_9 : i32
      %c0_i32_10 = arith.constant 0 : i32
      %8 = arith.addi %c0_i32_10, %7 : i32
      %c0_11 = arith.constant 0 : index
      %c0_12 = arith.constant 0 : index
      %9 = vector.load %arg5[%c0_11, %c0_12] : memref<8x32xf32, #tpu.memory_space<vmem>>, vector<8x32xf32>
      %c0_13 = arith.constant 0 : index
      %c0_14 = arith.constant 0 : index
      %10 = vector.load %arg6[%c0_13, %c0_14] : memref<8x32xf32, #tpu.memory_space<vmem>>, vector<8x32xf32>
      %11 = arith.index_cast %8 : i32 to index
      %c0_15 = arith.constant 0 : index
      %c0_16 = arith.constant 0 : index
      %12 = vector.load %arg1[%11, %c0_15, %c0_16] : memref<8x8x128xf32, #tpu.memory_space<vmem>>, vector<1x8x128xf32>
      %13 = vector.shape_cast %12 : vector<1x8x128xf32> to vector<8x128xf32>
      %c0_17 = arith.constant 0 : index
      %c0_18 = arith.constant 0 : index
      %14 = vector.load %arg3[%c0_17, %c0_18] : memref<32x128xf32, #tpu.memory_space<vmem>>, vector<32x128xf32>
      %cst_19 = arith.constant dense<0.000000e+00> : vector<8x128xf32>
      %15 = tpu.matmul %9, %14, %cst_19 {dimension_numbers = #tpu.dot_dimension_numbers<[1], [0], [0], [1], [0, 0, 1, 1], [], []>} : vector<8x32xf32>, vector<32x128xf32>, vector<8x128xf32> -> vector<8x128xf32>
      %16 = arith.addf %13, %15 : vector<8x128xf32>
      %17 = vector.extract_strided_slice %16 {offsets = [0, 0], sizes = [8, 32], strides = [1, 1]} : vector<8x128xf32> to vector<8x32xf32>
      %18 = arith.negf %17 : vector<8x32xf32>
      %19 = math.exp %18 : vector<8x32xf32>
      %cst_20 = arith.constant 1.000000e+00 : f32
      %20 = vector.broadcast %cst_20 : f32 to vector<8x32xf32>
      %21 = arith.addf %20, %19 : vector<8x32xf32>
      %22 = arith.divf %20, %21 : vector<8x32xf32>
      %23 = vector.extract_strided_slice %16 {offsets = [0, 32], sizes = [8, 32], strides = [1, 1]} : vector<8x128xf32> to vector<8x32xf32>
      %24 = arith.negf %23 : vector<8x32xf32>
      %25 = math.exp %24 : vector<8x32xf32>
      %cst_21 = arith.constant 1.000000e+00 : f32
      %26 = vector.broadcast %cst_21 : f32 to vector<8x32xf32>
      %27 = arith.addf %26, %25 : vector<8x32xf32>
      %28 = arith.divf %26, %27 : vector<8x32xf32>
      %29 = vector.extract_strided_slice %16 {offsets = [0, 64], sizes = [8, 32], strides = [1, 1]} : vector<8x128xf32> to vector<8x32xf32>
      %30 = math.tanh %29 : vector<8x32xf32>
      %31 = vector.extract_strided_slice %16 {offsets = [0, 96], sizes = [8, 32], strides = [1, 1]} : vector<8x128xf32> to vector<8x32xf32>
      %32 = arith.negf %31 : vector<8x32xf32>
      %33 = math.exp %32 : vector<8x32xf32>
      %cst_22 = arith.constant 1.000000e+00 : f32
      %34 = vector.broadcast %cst_22 : f32 to vector<8x32xf32>
      %35 = arith.addf %34, %33 : vector<8x32xf32>
      %36 = arith.divf %34, %35 : vector<8x32xf32>
      %37 = arith.mulf %28, %10 : vector<8x32xf32>
      %38 = arith.mulf %22, %30 : vector<8x32xf32>
      %39 = arith.addf %37, %38 : vector<8x32xf32>
      %40 = math.tanh %39 : vector<8x32xf32>
      %41 = arith.mulf %36, %40 : vector<8x32xf32>
      %c0_23 = arith.constant 0 : index
      %c0_24 = arith.constant 0 : index
      %42 = vector.load %arg2[%c0_23, %c0_24] : memref<8x1xi32, #tpu.memory_space<vmem>>, vector<8x1xi32>
      %43 = vector.broadcast %8 : i32 to vector<8x1xi32>
      %44 = arith.cmpi sgt, %42, %43 : vector<8x1xi32>
      %45 = vector.shape_cast %44 : vector<8x1xi1> to vector<8x1xi1>
      %46 = vector.broadcast %45 : vector<8x1xi1> to vector<8x32xi1>
      %47 = arith.select %46, %41, %9 : vector<8x32xi1>, vector<8x32xf32>
      %c0_25 = arith.constant 0 : index
      %c0_26 = arith.constant 0 : index
      %48 = vector.load %arg5[%c0_25, %c0_26] : memref<8x32xf32, #tpu.memory_space<vmem>>, vector<8x32xf32>
      tpu.vector_store %arg5[%c0_25, %c0_26], %47 {strides = array<i32>} : memref<8x32xf32, #tpu.memory_space<vmem>>, vector<8x32xf32>,
      %49 = vector.shape_cast %44 : vector<8x1xi1> to vector<8x1xi1>
      %50 = vector.broadcast %49 : vector<8x1xi1> to vector<8x32xi1>
      %51 = arith.select %50, %39, %10 : vector<8x32xi1>, vector<8x32xf32>
      %c0_27 = arith.constant 0 : index
      %c0_28 = arith.constant 0 : index
      %52 = vector.load %arg6[%c0_27, %c0_28] : memref<8x32xf32, #tpu.memory_space<vmem>>, vector<8x32xf32>
      tpu.vector_store %arg6[%c0_27, %c0_28], %51 {strides = array<i32>} : memref<8x32xf32, #tpu.memory_space<vmem>>, vector<8x32xf32>,
    }
    %c8_i32_4 = arith.constant 8 : i32
    %c0_5 = arith.constant 0 : index
    %c0_6 = arith.constant 0 : index
    %5 = vector.load %arg5[%c0_5, %c0_6] : memref<8x32xf32, #tpu.memory_space<vmem>>, vector<8x32xf32>
    %c0_7 = arith.constant 0 : index
    %c0_8 = arith.constant 0 : index
    %6 = vector.load %arg4[%c0_7, %c0_8] : memref<8x32xf32, #tpu.memory_space<vmem>>, vector<8x32xf32>
    tpu.vector_store %arg4[%c0_7, %c0_8], %5 {strides = array<i32>} : memref<8x32xf32, #tpu.memory_space<vmem>>, vector<8x32xf32>,
    return
  }
  func.func @transform_0(%arg0: i32) -> (i32, i32, i32) {
    %c0_i32 = arith.constant 0 : i32
    %c0_i32_0 = arith.constant 0 : i32
    %c0_i32_1 = arith.constant 0 : i32
    %c0_i32_2 = arith.constant 0 : i32
    return %c0_i32, %c0_i32_0, %c0_i32_1 : i32, i32, i32
  }
  func.func @transform_1(%arg0: i32) -> (i32, i32) {
    %c0_i32 = arith.constant 0 : i32
    %c0_i32_0 = arith.constant 0 : i32
    %c0_i32_1 = arith.constant 0 : i32
    return %c0_i32, %c0_i32_0 : i32, i32
  }
  func.func @transform_2(%arg0: i32) -> (i32, i32) {
    %c0_i32 = arith.constant 0 : i32
    %c0_i32_0 = arith.constant 0 : i32
    %c0_i32_1 = arith.constant 0 : i32
    return %c0_i32, %c0_i32_0 : i32, i32
  }
  func.func @transform_3(%arg0: i32) -> (i32, i32) {
    %c0_i32 = arith.constant 0 : i32
    %c0_i32_0 = arith.constant 0 : i32
    %c0_i32_1 = arith.constant 0 : i32
    return %c0_i32, %c0_i32_0 : i32, i32
  }
}

</mosaic_0001>

<bundles_post_ra>
// kernel: tpu_custom_call.1
= control target key start
LH: loop header
LB: loop body
LE: loop exit
PB: predicated region body
PF: predicated region fallthrough
CT: control target
= control target key end

     0   :  { %8 = vsyncpa [#allocation5], 0  ;;  %s438_s0 = inlined_call_operand.hbm [shape: f32[8,8,128], index: 0, kind: input, shape index: {}]   ;;  %s439_s1 = inlined_call_operand.vmem [shape: s32[8,1], index: 1, kind: input, shape index: {}]   ;;  %s440_s2 = inlined_call_operand.hbm [shape: f32[32,128], index: 2, kind: input, shape index: {}]   ;;  %s441_s3 = inlined_call_operand.hbm [shape: f32[8,32], index: 3, kind: output, shape index: {}]  }
   0x1   :  { %9 = vsyncpa [#allocation8], 0 }
   0x2   :  { %10 = vsyncpa [#allocation6], 0  ;;  %s347_s12 = smov [#allocation4]   ;;  %s267_s16 = scalar_lea.hbm %s438_s0, 1024 }
   0x3   :  { %s16_s13 = sshll.u32 %s347_s12, 4  ;;  %p268_p0 = scmp.ne.s32.totalorder %s438_s0, %s267_s16  ;;  %s17_s13 = int_to_ptr.vmem [resolvable:$true] %s16_s13 }
   0x4   :  { %p271_p1 = scmp.lt.u32.totalorder %s267_s16, %s438_s0 }
   0x6   :  { %p273_p2 = pnand %p271_p1, %p268_p0 }
   0x8   :  { %276 = shalt.err (!%p273_p2)
}
   0x9   :  { %s277_s21 = scalar_lea.vmem %s17_s13, 1024  ;;  %p282_p4 = scmp.lt.s32.totalorder %s17_s13, %s17_s13 }
   0xa   :  { %p278_p3 = scmp.ne.s32.totalorder %s17_s13, %s277_s21  ;;  %p283_p5 = scmp.lt.s32.totalorder %s277_s21, %s277_s21 }
   0xc   :  { %p284_p6 = por %p283_p5, %p282_p4 }
   0xe   :  { %p285_p7 = pnand %p284_p6, %p278_p3 }
  0x10   :  { %288 = shalt.err (!%p285_p7)
}
  0x11   :  { %s348_s22 = smov 128   ;;  %s349_s23 = smov 8  }
  0x12   :  { %22 = dma.hbm_to_vmem [thread:$0]  %s438_s0, 1024, %s17_s13, [#allocation5], %s348_s22, %s348_s22, %s349_s23  }
  0x13   :  { %s350_s26 = smov [#allocation7]   ;;  %s289_s30 = scalar_lea.hbm %s440_s2, 512 }
  0x14   :  { %s30_s27 = sshll.u32 %s350_s26, 4  ;;  %p290_p8 = scmp.ne.s32.totalorder %s440_s2, %s289_s30  ;;  %s31_s27 = int_to_ptr.vmem [resolvable:$true] %s30_s27 }
  0x15   :  { %p293_p9 = scmp.lt.u32.totalorder %s289_s30, %s440_s2 }
  0x17   :  { %p295_p10 = pnand %p293_p9, %p290_p8 }
  0x19   :  { %298 = shalt.err (!%p295_p10)
}
  0x1a   :  { %s299_s8 = scalar_lea.vmem %s31_s27, 512  ;;  %p304_p12 = scmp.lt.s32.totalorder %s31_s27, %s31_s27 }
  0x1b   :  { %p300_p11 = scmp.ne.s32.totalorder %s31_s27, %s299_s8  ;;  %p305_p13 = scmp.lt.s32.totalorder %s299_s8, %s299_s8 }
  0x1d   :  { %p306_p0 = por %p305_p13, %p304_p12 }
  0x1f   :  { %p307_p1 = pnand %p306_p0, %p300_p11 }
  0x21   :  { %310 = shalt.err (!%p307_p1)
}
  0x22   :  { %36 = dma.hbm_to_vmem [thread:$0]  %s440_s2, 512, %s31_s27, [#allocation8], %s348_s22, %s348_s22, %s349_s23  }
  0x23   :  { %337 = dma.done.wait [#allocation5], 1024  }
  0x24   :  { %338 = vsyncadd [#allocation5], 4294966272 }
  0x25   :  { %339 = dma.done.wait [#allocation8], 512  }
  0x26   :  { %340 = vsyncadd [#allocation8], 4294966784  ;;  %vm43_vm0 = vcmask 261120   ;;  %v351_v0 = vmov 0.0   ;;  %s406_s10 = smov 0  }
  0x27   :  { %44 = vst.msk [vmem:[#allocation2] sm:$0xff] %vm43_vm0, %v351_v0  ;;  %45 = vst.msk [vmem:[#allocation3] sm:$0xff] %vm43_vm0, %v351_v0 }
  0x28 LB: > { %v57_v1 = vld [vmem:[#allocation7] sm:$0xff]  ;;  %v58_v2 = vld [vmem:[#allocation7 + $0x8] sm:$0xff]  ;;  %v59_v3 = vld [vmem:[#allocation7 + $0x10] sm:$0xff]  ;;  %v352_v4 = vmov 0.0|0.0   ;;  %vm353_vm1 = vmmov 0   ;;  %v354_v7 = vmov 0.0   ;;  %v164_v21 = vstv %s345_s10  ;;  %s345_s10 = sphi %s406_s10, %s51_s10  }
  0x29   : > { %230 = vmatprep.subr.bf16.mxu0 %v352_v4  ;;  %v231_v5 = vpack.c.bf16 %v58_v2, %v57_v1  ;;  %v60_v6 = vld [vmem:[#allocation7 + $0x18] sm:$0xff]  ;;  %227 = vmatprep.mubr.msk.f32.mxu0 %vm353_vm1, %v354_v7  ;;  %s211_s2 = sshll.u32 %s345_s10, 3  ;;  %v355_v14 = vmov 0   ;;  %s356_s12 = smov 64   ;;  %v163_v20 = vld [vmem:[%s439_s1] sm:$0xff] }
  0x2a   : > { %v234_v8 = vpack.c.bf16 %v60_v6, %v59_v3  ;;  %s55_s11 = scalar_lea.vmem [#allocation4], %s211_s2  ;;  %257 = vset.pattern.permute.xlu1 %v355_v14  ;;  %258 = vset.pattern.permute.xlu0 %v355_v14  ;;  %s357_s13 = smov 32   ;;  %vm165_vm2 = vcmp.gt.s32.totalorder %v163_v20, %v164_v21 }
  0x2b   : > { %232 = vmatpush3.bf16.msra.mxu0 %v231_v5  ;;  %v56_v10 = vld [vmem:[%s55_s11] sm:$0xff]  ;;  %v166_v25 = vsel %vm165_vm2, 1, %v355_v14  ;;  %s358_s16 = smov 96   ;;  %s51_s10 = sadd.s32 1, %s345_s10  }
  0x2c   : > { %233 = vmatprep.subr.bf16.mxu0 %v352_v4  ;;  %p48_p2 = scmp.ge.s32.totalorder %s51_s10, 8  }
  0x2d   :  { %s359_s17 = smov (%p48_p2), [#allocation9]  }
  0x2e   : > { %v52_v9 = vld [vmem:[#allocation2] sm:$0xff]  ;;  %v53_v16 = vld [vmem:[#allocation3] sm:$0xff]  ;;  %s194_s18 = sshll.u32 (%p48_p2), %s359_s17, 4  ;;  %s195_s18 = int_to_ptr.vmem [resolvable:$true] %s194_s18 }
  0x2f   : > { %235 = vmatpush3.bf16.msra.mxu0 %v234_v8  ;;  %s311_s19 = scalar_lea.vmem (%p48_p2), %s195_s18, 128  ;;  %p316_p4 = scmp.lt.s32.totalorder (%p48_p2), %s195_s18, %s195_s18 }
  0x30   :  { %p312_p3 = scmp.ne.s32.totalorder (%p48_p2), %s195_s18, %s311_s19  ;;  %p317_p5 = scmp.lt.s32.totalorder (%p48_p2), %s311_s19, %s311_s19 }
  0x32   : > { %228 = vmatmul.mubr.msk.f32.vlgmr.msra.gmra.mrb[0].mxu0 %vm43_vm0, %v52_v9  ;;  %p318_p6 = por (%p48_p2), %p317_p5, %p316_p4 }
  0x34   :  { %p319_p7 = pnand (%p48_p2), %p318_p6, %p312_p3 }
 0x105   : > { %v130_v11 = vpop.f32.mrb[0].mxu0 }
 0x106   : > { %v134_v12 = vadd.f32 %v130_v11, %v56_v10  ;;  %v229_v13 = vpop.f32.mrb[1].mxu0 }
 0x108   : > { %259 = vtanh.f32 %v134_v12  ;;  %v213_v17 = vmul.f32 -1.442695, %v134_v12 }
 0x10a   : > { %261 = vpow2.f32 %v213_v17 }
 0x112   : > { %v260_v15 = vpop.eup %259 }
 0x113   : > { %148 = vrot.lane.b32.xlu0 %v260_v15, %s356_s12 }
 0x114   : > { %v262_v18 = vpop.eup %261 }
 0x115   : > { %v138_v19 = vadd.f32 1.0, %v262_v18 }
 0x117   : > { %143 = vrot.lane.b32.xlu0 %v53_v16, %s357_s13  ;;  %263 = vrcp.f32 %v138_v19 }
 0x121   : > { %v264_v22 = vpop.eup %263 }
 0x185   : > { %v149_v23 = vpop.permute.xlu0 %148 }
 0x186   : > { %v151_v24 = vmul.f32 %v264_v22, %v149_v23 }
 0x188   : > { %153 = vrot.lane.b32.xlu1 %v151_v24, %s357_s13 }
 0x189   : > { %v144_v26 = vpop.permute.xlu0 %143 }
 0x18a   : > { %v146_v27 = vmul.f32 %v264_v22, %v144_v26 }
 0x18c   : > { %168 = vperm.xlu1 %257, %v166_v25  }
 0x190   : > { %171 = vrot.lane.b32.xlu1 %v52_v9, %s358_s16 }
 0x1fa   : > { %v154_v28 = vpop.permute.xlu1 %153 }
 0x1fb   : > { %v156_v29 = vadd.f32 %v154_v28, %v146_v27 }
 0x1fd   : > { %265 = vtanh.f32 %v156_v29 }
 0x207   : > { %v266_v30 = vpop.eup %265 }
 0x208   : > { %159 = vrot.lane.b32.xlu0 %v266_v30, %s356_s12 }
 0x20b   : > { %v169_v31 = vpop.permute.xlu1 %168 }
 0x20c   : > { %vm170_vm3 = vcmp.eq.s32.totalorder %v169_v31, 1 }
 0x20d   : > { %v180_v32 = vsel %vm170_vm3, %v156_v29, %v144_v26 }
 0x20e   : > { %182 = vrot.lane.b32.xlu1 %v180_v32, %s358_s16 }
 0x20f   : > { %v172_v34 = vpop.permute.xlu1 %171 }
 0x27a   : > { %v160_v33 = vpop.permute.xlu0 %159 }
 0x27b   : > { %v162_v35 = vmul.f32 %v264_v22, %v160_v33 }
 0x27d   : > { %v174_v36 = vsel %vm170_vm3, %v162_v35, %v172_v34 }
 0x27e   : > { %176 = vrot.lane.b32.xlu0 %v174_v36, %s357_s13 }
 0x280   : > { %v183_v37 = vpop.permute.xlu1 %182 }
 0x281   : > { %185 = vst.msk [vmem:[#allocation3] sm:$0xff] %vm43_vm0, %v183_v37 }
 0x2eb   :  { %50 = sbr.rel (!%p48_p2) target bundleno = 40 (0x28), region = 48 }
 0x2f0   : > { %v177_v38 = vpop.permute.xlu0 %176 }
 0x2f1   : > { %179 = vst.msk [vmem:[#allocation2] sm:$0xff] %vm43_vm0, %v177_v38 }
 0x2f8   :  { %v186_v39 = vld [vmem:[#allocation2] sm:$0xff] }
 0x2f9   :  { %187 = vst.msk [vmem:[#allocation9] sm:$0xff] %vm43_vm0, %v186_v39 }
 0x2fa   :  { %322 = shalt.err (!%p319_p7)
}
 0x2fb   :  { %s323_s22 = scalar_lea.hbm %s441_s3, 128 }
 0x2fc   :  { %p324_p8 = scmp.ne.s32.totalorder %s441_s3, %s323_s22  ;;  %p327_p9 = scmp.lt.u32.totalorder %s323_s22, %s441_s3 }
 0x2fe   :  { %p329_p10 = pnand %p327_p9, %p324_p8 }
 0x300   :  { %332 = shalt.err (!%p329_p10)
}
 0x301   :  { %197 = dma.vmem_to_hbm [thread:$0]  %s195_s18, 128, %s441_s3, [#allocation6]  }
 0x302   :  { %341 = dma.done.wait [#allocation6], 128  }
 0x303   :  { %342 = vsyncadd [#allocation6], 4294967168 }
 0x304   :  { %201 = vsyncpa [#allocation5], 1 }
 0x305   :  { %202 = vsyncpa [#allocation8], 1 }
 0x306   :  { %203 = vsyncpa [#allocation6], 1 }

</bundles_post_ra>
